<compile_context>
chip_gen: v7x
topology: tpu7x:2x2x1
jax: 0.10.0
libtpu: 0.0.40
codegen_flags: <defaults>
</compile_context>

<pallas_src>
import functools

import jax
import jax.numpy as jnp
import numpy as np
from jax.experimental import pallas as pl
from jax.experimental.pallas import tpu as pltpu


# ----------------------------------------------------------------------------
# Kernel: one batch *block* per grid step.
# ----------------------------------------------------------------------------
def spectral_conv1d_kernel(x_ref, fwd_ref, w_ref, inv_ref, o_ref):
    """Shapes (Mh = modes rounded up to the f32 sublane granularity, 8):

    x_ref:   (BB, Cin, N)        input tile (f32)
    fwd_ref: (2, N, Mh)          truncated rfft matrices: [cos ; -sin]
    w_ref:   (2, Cin, Cout, Mh)  complex weights: [Re(W) ; Im(W)], modes on lanes
    inv_ref: (2, Mh, N)          truncated irfft matrices: [c*cos/N ; -c*sin/N]
    o_ref:   (BB, Cout, N)       output tile
    Padded mode columns/rows/weights are exact zeros.
    """
    bb, cin, n = x_ref.shape
    cout, mh = w_ref.shape[2], w_ref.shape[3]

    # 1) Truncated rfft: two MXU matmuls with batch*channel flattened into the
    #    M dimension; the mode axis lands on lanes and stays there.
    x2 = x_ref[...].reshape(bb * cin, n)
    xr = jnp.dot(x2, fwd_ref[0], preferred_element_type=jnp.float32)   # Re(x_ft)
    xi = jnp.dot(x2, fwd_ref[1], preferred_element_type=jnp.float32)   # Im(x_ft)
    xr = xr.reshape(bb, cin, mh)
    xi = xi.reshape(bb, cin, mh)

    # 2) Complex mode mixing on the VPU (no corner-turn transposes, no per-mode
    #    micro-matmuls):  out_ft[b,o,m] = sum_i x_ft[b,i,m] * W[i,o,m].
    w_r = w_ref[0]                                     # (Cin, Cout, Mh)
    w_i = w_ref[1]
    acc_re = jnp.zeros((bb, cout, mh), jnp.float32)
    acc_im = jnp.zeros((bb, cout, mh), jnp.float32)
    for i in range(cin):                               # static unroll over Cin
        xr_i = xr[:, i:i + 1, :]                       # (BB, 1, Mh)  sublane bcast
        xi_i = xi[:, i:i + 1, :]
        wr_i = w_r[i][None]                            # (1, Cout, Mh)
        wi_i = w_i[i][None]
        acc_re = acc_re + xr_i * wr_i - xi_i * wi_i
        acc_im = acc_im + xr_i * wi_i + xi_i * wr_i

    # 3) Truncated irfft: two MXU matmuls (M = BB*Cout, K = Mh) + one add.
    #    Output lane axis = N -> lane-dense stores at production N.
    y = (jnp.dot(acc_re.reshape(bb * cout, mh), inv_ref[0],
                 preferred_element_type=jnp.float32)
         + jnp.dot(acc_im.reshape(bb * cout, mh), inv_ref[1],
                   preferred_element_type=jnp.float32))
    o_ref[...] = y.reshape(bb, cout, n).astype(o_ref.dtype)


# ----------------------------------------------------------------------------
# Constant construction (hoist out of the per-call forward).
# ----------------------------------------------------------------------------
def make_spectral_conv1d_params(w_re, w_im, n_spatial, dtype=jnp.float32):
    """Builds the truncated DFT matrices and packed weights once.

    w_re, w_im: [Cin, Cout, modes] real/imag parts of the complex weights.
    Returns (fwd, w, inv) suitable for spectral_conv1d_apply.
    """
    cin, cout, modes = w_re.shape
    if modes > n_spatial // 2 + 1:
        raise ValueError(f"modes={modes} must be <= N//2 + 1 = {n_spatial // 2 + 1}")
    mh = ((modes + 7) // 8) * 8          # sublane-granular mode padding (f32)

    k = np.arange(modes)[None, :]
    nn = np.arange(n_spatial)[:, None]
    ang = 2.0 * np.pi * nn * k / n_spatial                 # (N, modes)

    # Forward: X[k] = sum_n x[n] * (cos - j*sin).
    fwd = np.zeros((2, n_spatial, mh), np.float64)
    fwd[0, :, :modes] = np.cos(ang)                        # -> Re(x_ft)
    fwd[1, :, :modes] = -np.sin(ang)                       # -> Im(x_ft)

    # Inverse (irfft with length N): Hermitian symmetry folded into c_k.
    c = np.full((modes,), 2.0)
    c[0] = 1.0
    if n_spatial % 2 == 0 and modes - 1 == n_spatial // 2:
        c[-1] = 1.0                                        # Nyquist counted once
    inv = np.zeros((2, mh, n_spatial), np.float64)
    inv[0, :modes] = c[:, None] * np.cos(ang.T) / n_spatial   # from Re(out_ft)
    inv[1, :modes] = -c[:, None] * np.sin(ang.T) / n_spatial  # from Im(out_ft)

    pad = ((0, 0), (0, 0), (0, mh - modes))
    w = jnp.stack([jnp.pad(w_re.astype(dtype), pad),
                   jnp.pad(w_im.astype(dtype), pad)])      # (2, Cin, Cout, Mh)
    return (jnp.asarray(fwd, dtype), w, jnp.asarray(inv, dtype))


def _zero3(i):
    return (0, 0, 0)


def _zero4(i):
    return (0, 0, 0, 0)


def _const_spec(shape, single_buffer):
    zmap = _zero4 if len(shape) == 4 else _zero3
    if single_buffer:
        # Constant index_map -> never re-fetched; a second buffer is pure waste.
        return pl.BlockSpec(shape, zmap, pipeline_mode=pl.Buffered(1))
    return pl.BlockSpec(shape, zmap)


# ----------------------------------------------------------------------------
# pallas_call wrapper.
# ----------------------------------------------------------------------------
@functools.partial(jax.jit, static_argnames=("block_b", "single_buffer_consts"))
def spectral_conv1d_apply(x, fwd, w, inv, *, block_b=8, single_buffer_consts=True):
    """x: [B, Cin, N] (f32).  fwd/w/inv from make_spectral_conv1d_params."""
    b, cin, n = x.shape
    cout, mh = w.shape[2], w.shape[3]

    # Batch blocking: keep >= 2 grid steps whenever B >= 2 so the DMA pipeline has
    # work to overlap and v7x's two TensorCores can split the parallel axis.
    bb = max(1, min(block_b, pl.cdiv(b, 2)))
    b_pad = pl.cdiv(b, bb) * bb
    xc = x.astype(fwd.dtype)
    if b_pad != b:
        xc = jnp.pad(xc, ((0, b_pad - b), (0, 0), (0, 0)))

    # VMEM budget: ~3/4 of this generation's per-core capacity
    # (v7x: 64 MiB -> ~48 MiB, v5e/v6e: 128 MiB -> ~96 MiB), capped at 100 MiB.
    try:
        vmem_cap = int(pltpu.get_tpu_info().vmem_capacity_bytes)
    except Exception:
        vmem_cap = 64 * 1024 * 1024
    vmem_limit = int(min(vmem_cap * 3 // 4, 100 * 1024 * 1024))

    grid = (b_pad // bb,)
    flops = 4 * b_pad * n * mh * (cin + cout) + 8 * b_pad * cin * cout * mh
    bytes_accessed = 4 * (b_pad * cin * n + b_pad * cout * n
                          + fwd.size + w.size + inv.size)

    out = pl.pallas_call(
        spectral_conv1d_kernel,
        out_shape=jax.ShapeDtypeStruct((b_pad, cout, n), xc.dtype),
        grid=grid,
        in_specs=[
            pl.BlockSpec((bb, cin, n), lambda i: (i, 0, 0)),          # x tile
            _const_spec((2, n, mh), single_buffer_consts),            # fwd DFT
            _const_spec((2, cin, cout, mh), single_buffer_consts),    # weights
            _const_spec((2, mh, n), single_buffer_consts),            # inv DFT
        ],
        out_specs=pl.BlockSpec((bb, cout, n), lambda i: (i, 0, 0)),
        compiler_params=pltpu.CompilerParams(
            dimension_semantics=("parallel",),
            vmem_limit_bytes=vmem_limit,
        ),
        cost_estimate=pl.CostEstimate(flops=flops, transcendentals=0,
                                      bytes_accessed=bytes_accessed),
    )(xc, fwd, w, inv)
    return out[:b]


def spectral_conv1d(x, w_re, w_im, *, block_b=8):
    """Convenience wrapper: builds constants then applies the kernel."""
    fwd, w, inv = make_spectral_conv1d_params(w_re, w_im, x.shape[-1])
    try:
        return spectral_conv1d_apply(x, fwd, w, inv, block_b=block_b,
                                     single_buffer_consts=True)
    except Exception:
        # Graceful fallback if pipeline_mode=pl.Buffered(1) is unsupported.
        return spectral_conv1d_apply(x, fwd, w, inv, block_b=block_b,
                                     single_buffer_consts=False)


# ----------------------------------------------------------------------------
# Pure-JAX reference mirroring the PyTorch forward exactly.
# ----------------------------------------------------------------------------
def reference(x, w_re, w_im, modes):
    b, cin, n = x.shape
    cout = w_re.shape[1]
    w = (w_re + 1j * w_im).astype(jnp.complex64)
    x_ft = jnp.fft.rfft(x)                                  # [B, Cin, N//2+1]
    mixed = jnp.einsum('bix,iox->box', x_ft[:, :, :modes], w)
    out_ft = jnp.zeros((b, cout, n // 2 + 1), jnp.complex64)
    out_ft = out_ft.at[:, :, :modes].set(mixed)
    return jnp.fft.irfft(out_ft, n=n)


if __name__ == "__main__":
    master = jax.random.PRNGKey(0)

    def run_case(batch, cin, cout, n, modes, block_b, key):
        kx, kr, ki = jax.random.split(key, 3)
        x = jax.random.normal(kx, (batch, cin, n), dtype=jnp.float32)
        scale = 1.0 / (cin * cout)                # matches torch.rand init scale
        w_re = scale * jax.random.uniform(kr, (cin, cout, modes), dtype=jnp.float32)
        w_im = scale * jax.random.uniform(ki, (cin, cout, modes), dtype=jnp.float32)

        out = jax.block_until_ready(spectral_conv1d(x, w_re, w_im, block_b=block_b))
        ref = jax.block_until_ready(reference(x, w_re, w_im, modes))
        np.testing.assert_allclose(np.asarray(out), np.asarray(ref),
                                   rtol=5e-4, atol=5e-5)

    k1, k2 = jax.random.split(master)
    # Small demo shapes consistent with the module (modes <= N//2 + 1).
    run_case(batch=2, cin=4, cout=4, n=16, modes=8, block_b=8, key=k1)
    # A more production-like tile: modes=36 (module default), lane-dense N=128,
    # batch block > 1 (exercises the flattened-M matmul path and a 2-step grid).
    run_case(batch=8, cin=8, cout=8, n=128, modes=36, block_b=4, key=k2)

    print("KERNEL_OK")
</pallas_src>

<mosaic_0001>
module attributes {stable_mosaic.version = 11 : i64} {
  func.func @spectral_conv1d_kernel(%arg0: i32, %arg1: memref<1x4x16xf32, #tpu.memory_space<vmem>>, %arg2: memref<2x16x8xf32, #tpu.memory_space<vmem>>, %arg3: memref<2x4x4x8xf32, #tpu.memory_space<vmem>>, %arg4: memref<2x8x16xf32, #tpu.memory_space<vmem>>, %arg5: memref<1x4x16xf32, #tpu.memory_space<vmem>>) attributes {dimension_semantics = [#tpu.dimension_semantics<parallel>], iteration_bounds = array<i64: 2>, scalar_prefetch = 0 : i64, scratch_operands = 0 : i64, tpu.core_type = #tpu.core_type<tc>, window_params = [{transform_indices = @transform_0, window_bounds = array<i64: 1, 4, 16>}, {pipeline_mode = #tpu.pipeline_mode<synchronous>, transform_indices = @transform_1, window_bounds = array<i64: 2, 16, 8>}, {pipeline_mode = #tpu.pipeline_mode<synchronous>, transform_indices = @transform_2, window_bounds = array<i64: 2, 4, 4, 8>}, {pipeline_mode = #tpu.pipeline_mode<synchronous>, transform_indices = @transform_3, window_bounds = array<i64: 2, 8, 16>}, {transform_indices = @transform_4, window_bounds = array<i64: 1, 4, 16>}]} {
    %c0 = arith.constant 0 : index
    %c0_0 = arith.constant 0 : index
    %c0_1 = arith.constant 0 : index
    %0 = vector.load %arg1[%c0, %c0_0, %c0_1] : memref<1x4x16xf32, #tpu.memory_space<vmem>>, vector<1x4x16xf32>
    %1 = vector.shape_cast %0 : vector<1x4x16xf32> to vector<4x16xf32>
    %c0_2 = arith.constant 0 : index
    %c0_3 = arith.constant 0 : index
    %c0_4 = arith.constant 0 : index
    %2 = vector.load %arg2[%c0_2, %c0_3, %c0_4] : memref<2x16x8xf32, #tpu.memory_space<vmem>>, vector<1x16x8xf32>
    %3 = vector.shape_cast %2 : vector<1x16x8xf32> to vector<16x8xf32>
    %cst = arith.constant dense<0.000000e+00> : vector<4x8xf32>
    %4 = tpu.matmul %1, %3, %cst {dimension_numbers = #tpu.dot_dimension_numbers<[1], [0], [0], [1], [0, 0, 1, 1], [], []>} : vector<4x16xf32>, vector<16x8xf32>, vector<4x8xf32> -> vector<4x8xf32>
    %c1 = arith.constant 1 : index
    %c0_5 = arith.constant 0 : index
    %c0_6 = arith.constant 0 : index
    %5 = vector.load %arg2[%c1, %c0_5, %c0_6] : memref<2x16x8xf32, #tpu.memory_space<vmem>>, vector<1x16x8xf32>
    %6 = vector.shape_cast %5 : vector<1x16x8xf32> to vector<16x8xf32>
    %cst_7 = arith.constant dense<0.000000e+00> : vector<4x8xf32>
    %7 = tpu.matmul %1, %6, %cst_7 {dimension_numbers = #tpu.dot_dimension_numbers<[1], [0], [0], [1], [0, 0, 1, 1], [], []>} : vector<4x16xf32>, vector<16x8xf32>, vector<4x8xf32> -> vector<4x8xf32>
    %8 = vector.shape_cast %4 : vector<4x8xf32> to vector<1x4x8xf32>
    %9 = vector.shape_cast %7 : vector<4x8xf32> to vector<1x4x8xf32>
    %c0_8 = arith.constant 0 : index
    %c0_9 = arith.constant 0 : index
    %c0_10 = arith.constant 0 : index
    %c0_11 = arith.constant 0 : index
    %10 = vector.load %arg3[%c0_8, %c0_9, %c0_10, %c0_11] : memref<2x4x4x8xf32, #tpu.memory_space<vmem>>, vector<1x4x4x8xf32>
    %11 = vector.shape_cast %10 : vector<1x4x4x8xf32> to vector<4x4x8xf32>
    %c1_12 = arith.constant 1 : index
    %c0_13 = arith.constant 0 : index
    %c0_14 = arith.constant 0 : index
    %c0_15 = arith.constant 0 : index
    %12 = vector.load %arg3[%c1_12, %c0_13, %c0_14, %c0_15] : memref<2x4x4x8xf32, #tpu.memory_space<vmem>>, vector<1x4x4x8xf32>
    %13 = vector.shape_cast %12 : vector<1x4x4x8xf32> to vector<4x4x8xf32>
    %cst_16 = arith.constant 0.000000e+00 : f32
    %14 = vector.broadcast %cst_16 : f32 to vector<1x4x8xf32>
    %cst_17 = arith.constant 0.000000e+00 : f32
    %15 = vector.broadcast %cst_17 : f32 to vector<1x4x8xf32>
    %16 = vector.extract_strided_slice %8 {offsets = [0, 0, 0], sizes = [1, 1, 8], strides = [1, 1, 1]} : vector<1x4x8xf32> to vector<1x1x8xf32>
    %17 = vector.extract_strided_slice %9 {offsets = [0, 0, 0], sizes = [1, 1, 8], strides = [1, 1, 1]} : vector<1x4x8xf32> to vector<1x1x8xf32>
    %18 = vector.extract_strided_slice %11 {offsets = [0, 0, 0], sizes = [1, 4, 8], strides = [1, 1, 1]} : vector<4x4x8xf32> to vector<1x4x8xf32>
    %19 = vector.shape_cast %18 : vector<1x4x8xf32> to vector<4x8xf32>
    %20 = vector.shape_cast %19 : vector<4x8xf32> to vector<1x4x8xf32>
    %21 = vector.extract_strided_slice %13 {offsets = [0, 0, 0], sizes = [1, 4, 8], strides = [1, 1, 1]} : vector<4x4x8xf32> to vector<1x4x8xf32>
    %22 = vector.shape_cast %21 : vector<1x4x8xf32> to vector<4x8xf32>
    %23 = vector.shape_cast %22 : vector<4x8xf32> to vector<1x4x8xf32>
    %24 = vector.broadcast %16 : vector<1x1x8xf32> to vector<1x4x8xf32>
    %25 = arith.mulf %24, %20 : vector<1x4x8xf32>
    %26 = arith.addf %14, %25 : vector<1x4x8xf32>
    %27 = vector.broadcast %17 : vector<1x1x8xf32> to vector<1x4x8xf32>
    %28 = arith.mulf %27, %23 : vector<1x4x8xf32>
    %29 = arith.subf %26, %28 : vector<1x4x8xf32>
    %30 = vector.broadcast %16 : vector<1x1x8xf32> to vector<1x4x8xf32>
    %31 = arith.mulf %30, %23 : vector<1x4x8xf32>
    %32 = arith.addf %15, %31 : vector<1x4x8xf32>
    %33 = vector.broadcast %17 : vector<1x1x8xf32> to vector<1x4x8xf32>
    %34 = arith.mulf %33, %20 : vector<1x4x8xf32>
    %35 = arith.addf %32, %34 : vector<1x4x8xf32>
    %36 = vector.extract_strided_slice %8 {offsets = [0, 1, 0], sizes = [1, 1, 8], strides = [1, 1, 1]} : vector<1x4x8xf32> to vector<1x1x8xf32>
    %37 = vector.extract_strided_slice %9 {offsets = [0, 1, 0], sizes = [1, 1, 8], strides = [1, 1, 1]} : vector<1x4x8xf32> to vector<1x1x8xf32>
    %38 = vector.extract_strided_slice %11 {offsets = [1, 0, 0], sizes = [1, 4, 8], strides = [1, 1, 1]} : vector<4x4x8xf32> to vector<1x4x8xf32>
    %39 = vector.shape_cast %38 : vector<1x4x8xf32> to vector<4x8xf32>
    %40 = vector.shape_cast %39 : vector<4x8xf32> to vector<1x4x8xf32>
    %41 = vector.extract_strided_slice %13 {offsets = [1, 0, 0], sizes = [1, 4, 8], strides = [1, 1, 1]} : vector<4x4x8xf32> to vector<1x4x8xf32>
    %42 = vector.shape_cast %41 : vector<1x4x8xf32> to vector<4x8xf32>
    %43 = vector.shape_cast %42 : vector<4x8xf32> to vector<1x4x8xf32>
    %44 = vector.broadcast %36 : vector<1x1x8xf32> to vector<1x4x8xf32>
    %45 = arith.mulf %44, %40 : vector<1x4x8xf32>
    %46 = arith.addf %29, %45 : vector<1x4x8xf32>
    %47 = vector.broadcast %37 : vector<1x1x8xf32> to vector<1x4x8xf32>
    %48 = arith.mulf %47, %43 : vector<1x4x8xf32>
    %49 = arith.subf %46, %48 : vector<1x4x8xf32>
    %50 = vector.broadcast %36 : vector<1x1x8xf32> to vector<1x4x8xf32>
    %51 = arith.mulf %50, %43 : vector<1x4x8xf32>
    %52 = arith.addf %35, %51 : vector<1x4x8xf32>
    %53 = vector.broadcast %37 : vector<1x1x8xf32> to vector<1x4x8xf32>
    %54 = arith.mulf %53, %40 : vector<1x4x8xf32>
    %55 = arith.addf %52, %54 : vector<1x4x8xf32>
    %56 = vector.extract_strided_slice %8 {offsets = [0, 2, 0], sizes = [1, 1, 8], strides = [1, 1, 1]} : vector<1x4x8xf32> to vector<1x1x8xf32>
    %57 = vector.extract_strided_slice %9 {offsets = [0, 2, 0], sizes = [1, 1, 8], strides = [1, 1, 1]} : vector<1x4x8xf32> to vector<1x1x8xf32>
    %58 = vector.extract_strided_slice %11 {offsets = [2, 0, 0], sizes = [1, 4, 8], strides = [1, 1, 1]} : vector<4x4x8xf32> to vector<1x4x8xf32>
    %59 = vector.shape_cast %58 : vector<1x4x8xf32> to vector<4x8xf32>
    %60 = vector.shape_cast %59 : vector<4x8xf32> to vector<1x4x8xf32>
    %61 = vector.extract_strided_slice %13 {offsets = [2, 0, 0], sizes = [1, 4, 8], strides = [1, 1, 1]} : vector<4x4x8xf32> to vector<1x4x8xf32>
    %62 = vector.shape_cast %61 : vector<1x4x8xf32> to vector<4x8xf32>
    %63 = vector.shape_cast %62 : vector<4x8xf32> to vector<1x4x8xf32>
    %64 = vector.broadcast %56 : vector<1x1x8xf32> to vector<1x4x8xf32>
    %65 = arith.mulf %64, %60 : vector<1x4x8xf32>
    %66 = arith.addf %49, %65 : vector<1x4x8xf32>
    %67 = vector.broadcast %57 : vector<1x1x8xf32> to vector<1x4x8xf32>
    %68 = arith.mulf %67, %63 : vector<1x4x8xf32>
    %69 = arith.subf %66, %68 : vector<1x4x8xf32>
    %70 = vector.broadcast %56 : vector<1x1x8xf32> to vector<1x4x8xf32>
    %71 = arith.mulf %70, %63 : vector<1x4x8xf32>
    %72 = arith.addf %55, %71 : vector<1x4x8xf32>
    %73 = vector.broadcast %57 : vector<1x1x8xf32> to vector<1x4x8xf32>
    %74 = arith.mulf %73, %60 : vector<1x4x8xf32>
    %75 = arith.addf %72, %74 : vector<1x4x8xf32>
    %76 = vector.extract_strided_slice %8 {offsets = [0, 3, 0], sizes = [1, 1, 8], strides = [1, 1, 1]} : vector<1x4x8xf32> to vector<1x1x8xf32>
    %77 = vector.extract_strided_slice %9 {offsets = [0, 3, 0], sizes = [1, 1, 8], strides = [1, 1, 1]} : vector<1x4x8xf32> to vector<1x1x8xf32>
    %78 = vector.extract_strided_slice %11 {offsets = [3, 0, 0], sizes = [1, 4, 8], strides = [1, 1, 1]} : vector<4x4x8xf32> to vector<1x4x8xf32>
    %79 = vector.shape_cast %78 : vector<1x4x8xf32> to vector<4x8xf32>
    %80 = vector.shape_cast %79 : vector<4x8xf32> to vector<1x4x8xf32>
    %81 = vector.extract_strided_slice %13 {offsets = [3, 0, 0], sizes = [1, 4, 8], strides = [1, 1, 1]} : vector<4x4x8xf32> to vector<1x4x8xf32>
    %82 = vector.shape_cast %81 : vector<1x4x8xf32> to vector<4x8xf32>
    %83 = vector.shape_cast %82 : vector<4x8xf32> to vector<1x4x8xf32>
    %84 = vector.broadcast %76 : vector<1x1x8xf32> to vector<1x4x8xf32>
    %85 = arith.mulf %84, %80 : vector<1x4x8xf32>
    %86 = arith.addf %69, %85 : vector<1x4x8xf32>
    %87 = vector.broadcast %77 : vector<1x1x8xf32> to vector<1x4x8xf32>
    %88 = arith.mulf %87, %83 : vector<1x4x8xf32>
    %89 = arith.subf %86, %88 : vector<1x4x8xf32>
    %90 = vector.broadcast %76 : vector<1x1x8xf32> to vector<1x4x8xf32>
    %91 = arith.mulf %90, %83 : vector<1x4x8xf32>
    %92 = arith.addf %75, %91 : vector<1x4x8xf32>
    %93 = vector.broadcast %77 : vector<1x1x8xf32> to vector<1x4x8xf32>
    %94 = arith.mulf %93, %80 : vector<1x4x8xf32>
    %95 = arith.addf %92, %94 : vector<1x4x8xf32>
    %96 = vector.shape_cast %89 : vector<1x4x8xf32> to vector<4x8xf32>
    %c0_18 = arith.constant 0 : index
    %c0_19 = arith.constant 0 : index
    %c0_20 = arith.constant 0 : index
    %97 = vector.load %arg4[%c0_18, %c0_19, %c0_20] : memref<2x8x16xf32, #tpu.memory_space<vmem>>, vector<1x8x16xf32>
    %98 = vector.shape_cast %97 : vector<1x8x16xf32> to vector<8x16xf32>
    %cst_21 = arith.constant dense<0.000000e+00> : vector<4x16xf32>
    %99 = tpu.matmul %96, %98, %cst_21 {dimension_numbers = #tpu.dot_dimension_numbers<[1], [0], [0], [1], [0, 0, 1, 1], [], []>} : vector<4x8xf32>, vector<8x16xf32>, vector<4x16xf32> -> vector<4x16xf32>
    %100 = vector.shape_cast %95 : vector<1x4x8xf32> to vector<4x8xf32>
    %c1_22 = arith.constant 1 : index
    %c0_23 = arith.constant 0 : index
    %c0_24 = arith.constant 0 : index
    %101 = vector.load %arg4[%c1_22, %c0_23, %c0_24] : memref<2x8x16xf32, #tpu.memory_space<vmem>>, vector<1x8x16xf32>
    %102 = vector.shape_cast %101 : vector<1x8x16xf32> to vector<8x16xf32>
    %cst_25 = arith.constant dense<0.000000e+00> : vector<4x16xf32>
    %103 = tpu.matmul %100, %102, %cst_25 {dimension_numbers = #tpu.dot_dimension_numbers<[1], [0], [0], [1], [0, 0, 1, 1], [], []>} : vector<4x8xf32>, vector<8x16xf32>, vector<4x16xf32> -> vector<4x16xf32>
    %104 = arith.addf %99, %103 : vector<4x16xf32>
    %105 = vector.shape_cast %104 : vector<4x16xf32> to vector<1x4x16xf32>
    %c0_26 = arith.constant 0 : index
    %c0_27 = arith.constant 0 : index
    %c0_28 = arith.constant 0 : index
    %106 = vector.load %arg5[%c0_26, %c0_27, %c0_28] : memref<1x4x16xf32, #tpu.memory_space<vmem>>, vector<1x4x16xf32>
    tpu.vector_store %arg5[%c0_26, %c0_27, %c0_28], %105 {strides = array<i32>} : memref<1x4x16xf32, #tpu.memory_space<vmem>>, vector<1x4x16xf32>,
    return
  }
  func.func @transform_0(%arg0: i32) -> (i32, i32, i32) {
    %c0_i32 = arith.constant 0 : i32
    %c0_i32_0 = arith.constant 0 : i32
    %c0_i32_1 = arith.constant 0 : i32
    return %arg0, %c0_i32, %c0_i32_0 : i32, i32, i32
  }
  func.func @transform_1(%arg0: i32) -> (i32, i32, i32) {
    %c0_i32 = arith.constant 0 : i32
    %c0_i32_0 = arith.constant 0 : i32
    %c0_i32_1 = arith.constant 0 : i32
    %c0_i32_2 = arith.constant 0 : i32
    return %c0_i32, %c0_i32_0, %c0_i32_1 : i32, i32, i32
  }
  func.func @transform_2(%arg0: i32) -> (i32, i32, i32, i32) {
    %c0_i32 = arith.constant 0 : i32
    %c0_i32_0 = arith.constant 0 : i32
    %c0_i32_1 = arith.constant 0 : i32
    %c0_i32_2 = arith.constant 0 : i32
    %c0_i32_3 = arith.constant 0 : i32
    return %c0_i32, %c0_i32_0, %c0_i32_1, %c0_i32_2 : i32, i32, i32, i32
  }
  func.func @transform_3(%arg0: i32) -> (i32, i32, i32) {
    %c0_i32 = arith.constant 0 : i32
    %c0_i32_0 = arith.constant 0 : i32
    %c0_i32_1 = arith.constant 0 : i32
    %c0_i32_2 = arith.constant 0 : i32
    return %c0_i32, %c0_i32_0, %c0_i32_1 : i32, i32, i32
  }
  func.func @transform_4(%arg0: i32) -> (i32, i32, i32) {
    %c0_i32 = arith.constant 0 : i32
    %c0_i32_0 = arith.constant 0 : i32
    %c0_i32_1 = arith.constant 0 : i32
    return %arg0, %c0_i32, %c0_i32_0 : i32, i32, i32
  }
}

module attributes {stable_mosaic.version = 11 : i64} {
  func.func @spectral_conv1d_kernel(%arg0: i32, %arg1: memref<1x4x16xf32, #tpu.memory_space<vmem>>, %arg2: memref<2x16x8xf32, #tpu.memory_space<vmem>>, %arg3: memref<2x4x4x8xf32, #tpu.memory_space<vmem>>, %arg4: memref<2x8x16xf32, #tpu.memory_space<vmem>>, %arg5: memref<1x4x16xf32, #tpu.memory_space<vmem>>) attributes {dimension_semantics = [#tpu.dimension_semantics<parallel>], iteration_bounds = array<i64: 2>, scalar_prefetch = 0 : i64, scratch_operands = 0 : i64, tpu.core_type = #tpu.core_type<tc>, window_params = [{transform_indices = @transform_0, window_bounds = array<i64: 1, 4, 16>}, {pipeline_mode = #tpu.pipeline_mode<synchronous>, transform_indices = @transform_1, window_bounds = array<i64: 2, 16, 8>}, {pipeline_mode = #tpu.pipeline_mode<synchronous>, transform_indices = @transform_2, window_bounds = array<i64: 2, 4, 4, 8>}, {pipeline_mode = #tpu.pipeline_mode<synchronous>, transform_indices = @transform_3, window_bounds = array<i64: 2, 8, 16>}, {transform_indices = @transform_4, window_bounds = array<i64: 1, 4, 16>}]} {
    %c0 = arith.constant 0 : index
    %c0_0 = arith.constant 0 : index
    %c0_1 = arith.constant 0 : index
    %0 = vector.load %arg1[%c0, %c0_0, %c0_1] : memref<1x4x16xf32, #tpu.memory_space<vmem>>, vector<1x4x16xf32>
    %1 = vector.shape_cast %0 : vector<1x4x16xf32> to vector<4x16xf32>
    %c0_2 = arith.constant 0 : index
    %c0_3 = arith.constant 0 : index
    %c0_4 = arith.constant 0 : index
    %2 = vector.load %arg2[%c0_2, %c0_3, %c0_4] : memref<2x16x8xf32, #tpu.memory_space<vmem>>, vector<1x16x8xf32>
    %3 = vector.shape_cast %2 : vector<1x16x8xf32> to vector<16x8xf32>
    %cst = arith.constant dense<0.000000e+00> : vector<4x8xf32>
    %4 = tpu.matmul %1, %3, %cst {dimension_numbers = #tpu.dot_dimension_numbers<[1], [0], [0], [1], [0, 0, 1, 1], [], []>} : vector<4x16xf32>, vector<16x8xf32>, vector<4x8xf32> -> vector<4x8xf32>
    %c1 = arith.constant 1 : index
    %c0_5 = arith.constant 0 : index
    %c0_6 = arith.constant 0 : index
    %5 = vector.load %arg2[%c1, %c0_5, %c0_6] : memref<2x16x8xf32, #tpu.memory_space<vmem>>, vector<1x16x8xf32>
    %6 = vector.shape_cast %5 : vector<1x16x8xf32> to vector<16x8xf32>
    %cst_7 = arith.constant dense<0.000000e+00> : vector<4x8xf32>
    %7 = tpu.matmul %1, %6, %cst_7 {dimension_numbers = #tpu.dot_dimension_numbers<[1], [0], [0], [1], [0, 0, 1, 1], [], []>} : vector<4x16xf32>, vector<16x8xf32>, vector<4x8xf32> -> vector<4x8xf32>
    %8 = vector.shape_cast %4 : vector<4x8xf32> to vector<1x4x8xf32>
    %9 = vector.shape_cast %7 : vector<4x8xf32> to vector<1x4x8xf32>
    %c0_8 = arith.constant 0 : index
    %c0_9 = arith.constant 0 : index
    %c0_10 = arith.constant 0 : index
    %c0_11 = arith.constant 0 : index
    %10 = vector.load %arg3[%c0_8, %c0_9, %c0_10, %c0_11] : memref<2x4x4x8xf32, #tpu.memory_space<vmem>>, vector<1x4x4x8xf32>
    %11 = vector.shape_cast %10 : vector<1x4x4x8xf32> to vector<4x4x8xf32>
    %c1_12 = arith.constant 1 : index
    %c0_13 = arith.constant 0 : index
    %c0_14 = arith.constant 0 : index
    %c0_15 = arith.constant 0 : index
    %12 = vector.load %arg3[%c1_12, %c0_13, %c0_14, %c0_15] : memref<2x4x4x8xf32, #tpu.memory_space<vmem>>, vector<1x4x4x8xf32>
    %13 = vector.shape_cast %12 : vector<1x4x4x8xf32> to vector<4x4x8xf32>
    %cst_16 = arith.constant 0.000000e+00 : f32
    %14 = vector.broadcast %cst_16 : f32 to vector<1x4x8xf32>
    %cst_17 = arith.constant 0.000000e+00 : f32
    %15 = vector.broadcast %cst_17 : f32 to vector<1x4x8xf32>
    %16 = vector.extract_strided_slice %8 {offsets = [0, 0, 0], sizes = [1, 1, 8], strides = [1, 1, 1]} : vector<1x4x8xf32> to vector<1x1x8xf32>
    %17 = vector.extract_strided_slice %9 {offsets = [0, 0, 0], sizes = [1, 1, 8], strides = [1, 1, 1]} : vector<1x4x8xf32> to vector<1x1x8xf32>
    %18 = vector.extract_strided_slice %11 {offsets = [0, 0, 0], sizes = [1, 4, 8], strides = [1, 1, 1]} : vector<4x4x8xf32> to vector<1x4x8xf32>
    %19 = vector.shape_cast %18 : vector<1x4x8xf32> to vector<4x8xf32>
    %20 = vector.shape_cast %19 : vector<4x8xf32> to vector<1x4x8xf32>
    %21 = vector.extract_strided_slice %13 {offsets = [0, 0, 0], sizes = [1, 4, 8], strides = [1, 1, 1]} : vector<4x4x8xf32> to vector<1x4x8xf32>
    %22 = vector.shape_cast %21 : vector<1x4x8xf32> to vector<4x8xf32>
    %23 = vector.shape_cast %22 : vector<4x8xf32> to vector<1x4x8xf32>
    %24 = vector.broadcast %16 : vector<1x1x8xf32> to vector<1x4x8xf32>
    %25 = arith.mulf %24, %20 : vector<1x4x8xf32>
    %26 = arith.addf %14, %25 : vector<1x4x8xf32>
    %27 = vector.broadcast %17 : vector<1x1x8xf32> to vector<1x4x8xf32>
    %28 = arith.mulf %27, %23 : vector<1x4x8xf32>
    %29 = arith.subf %26, %28 : vector<1x4x8xf32>
    %30 = vector.broadcast %16 : vector<1x1x8xf32> to vector<1x4x8xf32>
    %31 = arith.mulf %30, %23 : vector<1x4x8xf32>
    %32 = arith.addf %15, %31 : vector<1x4x8xf32>
    %33 = vector.broadcast %17 : vector<1x1x8xf32> to vector<1x4x8xf32>
    %34 = arith.mulf %33, %20 : vector<1x4x8xf32>
    %35 = arith.addf %32, %34 : vector<1x4x8xf32>
    %36 = vector.extract_strided_slice %8 {offsets = [0, 1, 0], sizes = [1, 1, 8], strides = [1, 1, 1]} : vector<1x4x8xf32> to vector<1x1x8xf32>
    %37 = vector.extract_strided_slice %9 {offsets = [0, 1, 0], sizes = [1, 1, 8], strides = [1, 1, 1]} : vector<1x4x8xf32> to vector<1x1x8xf32>
    %38 = vector.extract_strided_slice %11 {offsets = [1, 0, 0], sizes = [1, 4, 8], strides = [1, 1, 1]} : vector<4x4x8xf32> to vector<1x4x8xf32>
    %39 = vector.shape_cast %38 : vector<1x4x8xf32> to vector<4x8xf32>
    %40 = vector.shape_cast %39 : vector<4x8xf32> to vector<1x4x8xf32>
    %41 = vector.extract_strided_slice %13 {offsets = [1, 0, 0], sizes = [1, 4, 8], strides = [1, 1, 1]} : vector<4x4x8xf32> to vector<1x4x8xf32>
    %42 = vector.shape_cast %41 : vector<1x4x8xf32> to vector<4x8xf32>
    %43 = vector.shape_cast %42 : vector<4x8xf32> to vector<1x4x8xf32>
    %44 = vector.broadcast %36 : vector<1x1x8xf32> to vector<1x4x8xf32>
    %45 = arith.mulf %44, %40 : vector<1x4x8xf32>
    %46 = arith.addf %29, %45 : vector<1x4x8xf32>
    %47 = vector.broadcast %37 : vector<1x1x8xf32> to vector<1x4x8xf32>
    %48 = arith.mulf %47, %43 : vector<1x4x8xf32>
    %49 = arith.subf %46, %48 : vector<1x4x8xf32>
    %50 = vector.broadcast %36 : vector<1x1x8xf32> to vector<1x4x8xf32>
    %51 = arith.mulf %50, %43 : vector<1x4x8xf32>
    %52 = arith.addf %35, %51 : vector<1x4x8xf32>
    %53 = vector.broadcast %37 : vector<1x1x8xf32> to vector<1x4x8xf32>
    %54 = arith.mulf %53, %40 : vector<1x4x8xf32>
    %55 = arith.addf %52, %54 : vector<1x4x8xf32>
    %56 = vector.extract_strided_slice %8 {offsets = [0, 2, 0], sizes = [1, 1, 8], strides = [1, 1, 1]} : vector<1x4x8xf32> to vector<1x1x8xf32>
    %57 = vector.extract_strided_slice %9 {offsets = [0, 2, 0], sizes = [1, 1, 8], strides = [1, 1, 1]} : vector<1x4x8xf32> to vector<1x1x8xf32>
    %58 = vector.extract_strided_slice %11 {offsets = [2, 0, 0], sizes = [1, 4, 8], strides = [1, 1, 1]} : vector<4x4x8xf32> to vector<1x4x8xf32>
    %59 = vector.shape_cast %58 : vector<1x4x8xf32> to vector<4x8xf32>
    %60 = vector.shape_cast %59 : vector<4x8xf32> to vector<1x4x8xf32>
    %61 = vector.extract_strided_slice %13 {offsets = [2, 0, 0], sizes = [1, 4, 8], strides = [1, 1, 1]} : vector<4x4x8xf32> to vector<1x4x8xf32>
    %62 = vector.shape_cast %61 : vector<1x4x8xf32> to vector<4x8xf32>
    %63 = vector.shape_cast %62 : vector<4x8xf32> to vector<1x4x8xf32>
    %64 = vector.broadcast %56 : vector<1x1x8xf32> to vector<1x4x8xf32>
    %65 = arith.mulf %64, %60 : vector<1x4x8xf32>
    %66 = arith.addf %49, %65 : vector<1x4x8xf32>
    %67 = vector.broadcast %57 : vector<1x1x8xf32> to vector<1x4x8xf32>
    %68 = arith.mulf %67, %63 : vector<1x4x8xf32>
    %69 = arith.subf %66, %68 : vector<1x4x8xf32>
    %70 = vector.broadcast %56 : vector<1x1x8xf32> to vector<1x4x8xf32>
    %71 = arith.mulf %70, %63 : vector<1x4x8xf32>
    %72 = arith.addf %55, %71 : vector<1x4x8xf32>
    %73 = vector.broadcast %57 : vector<1x1x8xf32> to vector<1x4x8xf32>
    %74 = arith.mulf %73, %60 : vector<1x4x8xf32>
    %75 = arith.addf %72, %74 : vector<1x4x8xf32>
    %76 = vector.extract_strided_slice %8 {offsets = [0, 3, 0], sizes = [1, 1, 8], strides = [1, 1, 1]} : vector<1x4x8xf32> to vector<1x1x8xf32>
    %77 = vector.extract_strided_slice %9 {offsets = [0, 3, 0], sizes = [1, 1, 8], strides = [1, 1, 1]} : vector<1x4x8xf32> to vector<1x1x8xf32>
    %78 = vector.extract_strided_slice %11 {offsets = [3, 0, 0], sizes = [1, 4, 8], strides = [1, 1, 1]} : vector<4x4x8xf32> to vector<1x4x8xf32>
    %79 = vector.shape_cast %78 : vector<1x4x8xf32> to vector<4x8xf32>
    %80 = vector.shape_cast %79 : vector<4x8xf32> to vector<1x4x8xf32>
    %81 = vector.extract_strided_slice %13 {offsets = [3, 0, 0], sizes = [1, 4, 8], strides = [1, 1, 1]} : vector<4x4x8xf32> to vector<1x4x8xf32>
    %82 = vector.shape_cast %81 : vector<1x4x8xf32> to vector<4x8xf32>
    %83 = vector.shape_cast %82 : vector<4x8xf32> to vector<1x4x8xf32>
    %84 = vector.broadcast %76 : vector<1x1x8xf32> to vector<1x4x8xf32>
    %85 = arith.mulf %84, %80 : vector<1x4x8xf32>
    %86 = arith.addf %69, %85 : vector<1x4x8xf32>
    %87 = vector.broadcast %77 : vector<1x1x8xf32> to vector<1x4x8xf32>
    %88 = arith.mulf %87, %83 : vector<1x4x8xf32>
    %89 = arith.subf %86, %88 : vector<1x4x8xf32>
    %90 = vector.broadcast %76 : vector<1x1x8xf32> to vector<1x4x8xf32>
    %91 = arith.mulf %90, %83 : vector<1x4x8xf32>
    %92 = arith.addf %75, %91 : vector<1x4x8xf32>
    %93 = vector.broadcast %77 : vector<1x1x8xf32> to vector<1x4x8xf32>
    %94 = arith.mulf %93, %80 : vector<1x4x8xf32>
    %95 = arith.addf %92, %94 : vector<1x4x8xf32>
    %96 = vector.shape_cast %89 : vector<1x4x8xf32> to vector<4x8xf32>
    %c0_18 = arith.constant 0 : index
    %c0_19 = arith.constant 0 : index
    %c0_20 = arith.constant 0 : index
    %97 = vector.load %arg4[%c0_18, %c0_19, %c0_20] : memref<2x8x16xf32, #tpu.memory_space<vmem>>, vector<1x8x16xf32>
    %98 = vector.shape_cast %97 : vector<1x8x16xf32> to vector<8x16xf32>
    %cst_21 = arith.constant dense<0.000000e+00> : vector<4x16xf32>
    %99 = tpu.matmul %96, %98, %cst_21 {dimension_numbers = #tpu.dot_dimension_numbers<[1], [0], [0], [1], [0, 0, 1, 1], [], []>} : vector<4x8xf32>, vector<8x16xf32>, vector<4x16xf32> -> vector<4x16xf32>
    %100 = vector.shape_cast %95 : vector<1x4x8xf32> to vector<4x8xf32>
    %c1_22 = arith.constant 1 : index
    %c0_23 = arith.constant 0 : index
    %c0_24 = arith.constant 0 : index
    %101 = vector.load %arg4[%c1_22, %c0_23, %c0_24] : memref<2x8x16xf32, #tpu.memory_space<vmem>>, vector<1x8x16xf32>
    %102 = vector.shape_cast %101 : vector<1x8x16xf32> to vector<8x16xf32>
    %cst_25 = arith.constant dense<0.000000e+00> : vector<4x16xf32>
    %103 = tpu.matmul %100, %102, %cst_25 {dimension_numbers = #tpu.dot_dimension_numbers<[1], [0], [0], [1], [0, 0, 1, 1], [], []>} : vector<4x8xf32>, vector<8x16xf32>, vector<4x16xf32> -> vector<4x16xf32>
    %104 = arith.addf %99, %103 : vector<4x16xf32>
    %105 = vector.shape_cast %104 : vector<4x16xf32> to vector<1x4x16xf32>
    %c0_26 = arith.constant 0 : index
    %c0_27 = arith.constant 0 : index
    %c0_28 = arith.constant 0 : index
    %106 = vector.load %arg5[%c0_26, %c0_27, %c0_28] : memref<1x4x16xf32, #tpu.memory_space<vmem>>, vector<1x4x16xf32>
    tpu.vector_store %arg5[%c0_26, %c0_27, %c0_28], %105 {strides = array<i32>} : memref<1x4x16xf32, #tpu.memory_space<vmem>>, vector<1x4x16xf32>,
    return
  }
  func.func @transform_0(%arg0: i32) -> (i32, i32, i32) {
    %c0_i32 = arith.constant 0 : i32
    %c0_i32_0 = arith.constant 0 : i32
    %c0_i32_1 = arith.constant 0 : i32
    return %arg0, %c0_i32, %c0_i32_0 : i32, i32, i32
  }
  func.func @transform_1(%arg0: i32) -> (i32, i32, i32) {
    %c0_i32 = arith.constant 0 : i32
    %c0_i32_0 = arith.constant 0 : i32
    %c0_i32_1 = arith.constant 0 : i32
    %c0_i32_2 = arith.constant 0 : i32
    return %c0_i32, %c0_i32_0, %c0_i32_1 : i32, i32, i32
  }
  func.func @transform_2(%arg0: i32) -> (i32, i32, i32, i32) {
    %c0_i32 = arith.constant 0 : i32
    %c0_i32_0 = arith.constant 0 : i32
    %c0_i32_1 = arith.constant 0 : i32
    %c0_i32_2 = arith.constant 0 : i32
    %c0_i32_3 = arith.constant 0 : i32
    return %c0_i32, %c0_i32_0, %c0_i32_1, %c0_i32_2 : i32, i32, i32, i32
  }
  func.func @transform_3(%arg0: i32) -> (i32, i32, i32) {
    %c0_i32 = arith.constant 0 : i32
    %c0_i32_0 = arith.constant 0 : i32
    %c0_i32_1 = arith.constant 0 : i32
    %c0_i32_2 = arith.constant 0 : i32
    return %c0_i32, %c0_i32_0, %c0_i32_1 : i32, i32, i32
  }
  func.func @transform_4(%arg0: i32) -> (i32, i32, i32) {
    %c0_i32 = arith.constant 0 : i32
    %c0_i32_0 = arith.constant 0 : i32
    %c0_i32_1 = arith.constant 0 : i32
    return %arg0, %c0_i32, %c0_i32_0 : i32, i32, i32
  }
}

</mosaic_0001>

<bundles_post_ra>
// kernel: spectral_conv1d_apply.1
= control target key start
LH: loop header
LB: loop body
LE: loop exit
PB: predicated region body
PF: predicated region fallthrough
CT: control target
= control target key end

     0   :  { %9 = vsyncpa [#allocation3], 0  ;;  %s1131_s0 = inlined_call_operand.hbm [shape: f32[2,4,16], index: 0, kind: input, shape index: {}]   ;;  %s1132_s1 = inlined_call_operand.vmem [shape: f32[2,16,8], index: 1, kind: input, shape index: {}]   ;;  %s1133_s2 = inlined_call_operand.vmem [shape: f32[2,4,4,8], index: 2, kind: input, shape index: {}]   ;;  %s1134_s3 = inlined_call_operand.vmem [shape: f32[2,8,16], index: 3, kind: input, shape index: {}]   ;;  %s1135_s4 = inlined_call_operand.hbm [shape: f32[2,4,16], index: 4, kind: output, shape index: {}]  }
   0x1   :  { %11 = vsyncpa [#allocation3 + $0x1], 0 }
   0x2   :  { %12 = vsyncpa [#allocation4], 0 }
   0x3   :  { %14 = vsyncpa [#allocation4 + $0x1], 0  ;;  %s914_s15 = smov 0   ;;  %s916_s16 = smov 0  }
   0x4   :  { %s918_s17 = smov 0   ;;  %s920_s18 = smov 0  }
   0x5 LB: > { %s935_s19 = sadd.s32 4294967295, %s882_s18   ;;  %s672_s20 = sadd.s32 4294967294, %s882_s18   ;;  %s882_s18 = sphi %s920_s18, %s1150_s18   ;;  %s878_s17 = sphi %s918_s17, %s1149_s17   ;;  %s874_s16 = sphi %s916_s16, %s1148_s16   ;;  %s870_s15 = sphi %s914_s15, %s1147_s15  }
   0x6   : > { %s939_s21 = sadd.s32 1, %s882_s18   ;;  %s27_s22 = sadd.s32 1, %s878_s17 }
   0x7   : > { %s24_s23 = ssub.s32 %s882_s18, %s939_s21  ;;  %p34_p0 = scmp.ne.s32.totalorder %s878_s17, %s874_s16 }
   0x8   : > { %p25_p1 = scmp.eq.s32.totalorder %s24_s23, 0  ;;  %p35_p2 = scmp.eq.s32.totalorder %s882_s18, 0 }
   0x9   : > { %p40_p3 = scmp.ne.s32.totalorder %s874_s16, %s870_s15  ;;  %p41_p4 = scmp.eq.s32.totalorder %s935_s19, 0 }
   0xa   : > { %s951_s24 = scalar_select %p25_p1, %s878_s17, %s27_s22  }
   0xb   : > { %p953_p5 = por %p35_p2, %p34_p0  ;;  %p957_p6 = por %p41_p4, %p40_p3 }
   0xc   : > { %p127_p7 = scmp.eq.s32.totalorder %s935_s19, 1  ;;  %p133_p8 = scmp.eq.s32.totalorder %s672_s20, 1 }
   0xd   : > { %p749_p10 = scmp.lt.s32.totalorder %s882_s18, 2  ;;  %s162_s29 = sand.u32 1, %s878_s17  }
   0xe   : > { %p964_p11 = por %p127_p7, %p34_p0  ;;  %p968_p12 = por %p133_p8, %p40_p3 }
   0xf   : > { %s676_s30 = sshll.u32 %s882_s18, 6  ;;  %s675_s5 = sshll.u32 %s162_s29, 2 }
  0x10   : > { %s1139_s27 = scalar_select %p964_p11, 1, 0 }
  0x11   : > { %s1140_s28 = scalar_select %p968_p12, 1, 0 }
  0x12   : > { %s977_s8 = scalar_lea.hbm %s1131_s0, %s676_s30  ;;  %s166_s9 = scalar_lea.vmem [#allocation2], %s675_s5 }
  0x13   : > { %s173_s10 = sshll.u32 %s166_s9, 4  ;;  %p981_p13 = pnand %p749_p10, %p953_p5  ;;  %s985_s10 = int_to_ptr.vmem [resolvable:$true] %s173_s10 }
  0x14   : > { %s163_s12 = scalar_lea.sflag [#allocation3], %s162_s29  ;;  %s786_s13 = scalar_lea.hbm %s977_s8, 64 }
  0x15   : > { %p787_p2 = scmp.ne.s32.totalorder %s977_s8, %s786_s13  ;;  %p788_p3 = pneg %p981_p13 }
  0x16   : > { %s791_s22 = scalar_lea.hbm %s1131_s0, 128  ;;  %p792_p5 = scmp.lt.u32.totalorder %s977_s8, %s1131_s0 }
  0x17   : > { %p789_p4 = pnand %p788_p3, %p787_p2  ;;  %p793_p8 = scmp.lt.u32.totalorder %s791_s22, %s786_s13 }
  0x18   : > { %p795_p9 = scmp.lt.u32.totalorder %s786_s13, %s977_s8 }
  0x19   : > { %p790_p7 = pneg %p789_p4  ;;  %p794_p10 = por %p793_p8, %p792_p5 }
  0x1b   : > { %p796_p0 = por %p795_p9, %p794_p10 }
  0x1d   : > { %p797_p1 = pnand %p796_p0, %p790_p7 }
  0x1f   : > { %800 = shalt.err (!%p797_p1)
}
  0x20   : > { %s801_s29 = scalar_lea.vmem %s985_s10, 64  ;;  %s884_s30 = smov [#allocation2]  }
  0x21   : > { %p802_p2 = scmp.ne.s32.totalorder %s985_s10, %s801_s29  ;;  %s806_s5 = sshll.u32 %s884_s30, 4  ;;  %s807_s5 = int_to_ptr.vmem [resolvable:$false] %s806_s5 }
  0x22   : > { %s808_s6 = scalar_lea.vmem %s807_s5, 128  ;;  %p809_p11 = scmp.lt.s32.totalorder %s985_s10, %s807_s5 }
  0x23   : > { %p804_p4 = pnand %p802_p2, %p788_p3  ;;  %p810_p5 = scmp.lt.s32.totalorder %s808_s6, %s801_s29 }
  0x25   : > { %p805_p12 = pneg %p804_p4  ;;  %p811_p8 = por %p810_p5, %p809_p11 }
  0x27   : > { %p812_p9 = pnand %p811_p8, %p805_p12 }
  0x29   : > { %815 = shalt.err (!%p812_p9)
}
  0x2a   : > { %744 = dma.hbm_to_vmem [thread:$0]  (!%p981_p13), %s977_s8, 64, %s985_s10, %s163_s12  }
  0x2b   : > { %p1142_p0 = scmp.lt.s32.totalorder %s882_s18, 3  ;;  %p1143_p1 = scmp.ge.s32.totalorder %s882_s18, 1 }
  0x2d   : > { %p179_p3 = pnand %p1143_p1, %p1142_p0 }
  0x2e   : > { %s1019_s7 = sand.u32 (!%p179_p3), 1, %s874_s16  }
  0x2f   : > { %182 = sbr.rel (%p179_p3) target bundleno = 529 (0x211), region = 36  ;;  %s678_s9 = sshll.u32 (!%p179_p3), %s1019_s7, 2 }
  0x30   : > { %s185_s13 = scalar_lea.sflag (!%p179_p3), [#allocation3], %s1019_s7  ;;  %s188_s11 = scalar_lea.vmem (!%p179_p3), [#allocation2], %s678_s9 }
  0x36   : > { %861 = dma.done.wait (%p957_p6), %s185_s13, 64  }
  0x37   : > { %863 = vsyncadd (%p957_p6), %s185_s13, 4294967232  ;;  %v885_v0 = vmov 0.0|0.0   ;;  %vm886_vm0 = vmmov 0   ;;  %v887_v1 = vmov 0.0   ;;  %v214_v2 = vld [vmem:[%s1132_s1] sm:$0xff]  ;;  %v215_v3 = vld [vmem:[%s1132_s1 + $0x8] sm:$0xff]  ;;  %v372_v10 = vlaneseq }
  0x38   : > { %729 = vmatprep.subr.bf16.mxu1 %v885_v0  ;;  %709 = vmatprep.mubr.msk.f32.mxu1 %vm886_vm0, %v887_v1  ;;  %v730_v4 = vpack.c.bf16 %v215_v3, %v214_v2  ;;  %v681_v5 = vld [vmem:[%s1132_s1 + $0x10] sm:$0xff]  ;;  %v682_v6 = vld [vmem:[%s1132_s1 + $0x18] sm:$0xff]  ;;  %v213_v7 = vld [vmem:[%s188_s11] sm:$0xf]  ;;  %vm216_vm1 = vcmask 130048   ;;  %vm439_vm2 = vcmask 64512  }
  0x39   : > { %719 = vmatprep.subr.mxu0 %v887_v1  ;;  %721 = vmatprep.mubr.msk.f32.mxu0 %vm886_vm0, %v887_v1  ;;  %v733_v8 = vpack.c.bf16 %v682_v6, %v681_v5  ;;  %v688_v9 = vld [vmem:[%s1134_s3 + $0x8] sm:$0xff]  ;;  %v373_v11 = vshrl.u32 %v372_v10, 7  ;;  %v363_v17 = vld [vmem:[%s1133_s2] sm:$0xf]  ;;  %v684_v18 = vld [vmem:[%s1133_s2 + $0x10] sm:$0xf] }
  0x3a   : > { %731 = vmatpush3.bf16.msra.mxu1 %v730_v4  ;;  %720 = vmatpush3.msra.mxu0 %v688_v9  ;;  %v364_v24 = vld [vmem:[%s1133_s2 + $0x4] sm:$0xf]  ;;  %v685_v25 = vld [vmem:[%s1133_s2 + $0x14] sm:$0xf]  ;;  %v365_v37 = vld [vmem:[%s1133_s2 + $0x8] sm:$0xf] }
  0x3b   : > { %732 = vmatprep.subr.bf16.mxu1 %v885_v0  ;;  %724 = vmatprep.subr.mxu0 %v887_v1  ;;  %v374_v12 = vsub.s32 0, %v373_v11  ;;  %v390_v14 = vsub.s32 1, %v373_v11  ;;  %v406_v19 = vsub.s32 2, %v373_v11  ;;  %v422_v32 = vsub.s32 3, %v373_v11  ;;  %v686_v38 = vld [vmem:[%s1133_s2 + $0x18] sm:$0xf] }
  0x3c   : > { %v366_v49 = vld [vmem:[%s1133_s2 + $0xc] sm:$0xf]  ;;  %v687_v50 = vld [vmem:[%s1133_s2 + $0x1c] sm:$0xf]  ;;  %v436_v3 = vld [vmem:[%s1134_s3] sm:$0xff]  ;;  %s692_s13 = sshll.u32 %s935_s19, 6 }
  0x3d   : > { %710 = vmatmul.mubr.msk.f32.vlgmr.msra.gmra.mrb[0].mxu1 %vm216_vm1, %v213_v7  ;;  %s212_s11 = scalar_lea.vmem [#allocation5], %s678_s9  ;;  %vm586_vm3 = vcmask 125952   ;;  %s1087_s14 = scalar_lea.hbm %s1135_s4, %s692_s13 }
  0x3e   : > { %734 = vmatpush3.bf16.msra.mxu1 %v733_v8  ;;  %716 = vmatprep.mubr.msk.f32.mxu1 %vm886_vm0, %v887_v1  ;;  %s602_s8 = sshll.u32 %s212_s11, 4  ;;  %s589_s26 = scalar_lea.sflag [#allocation4], %s1019_s7  ;;  %s1089_s8 = int_to_ptr.vmem [resolvable:$true] %s602_s8 }
  0x3f   : > { %s816_s20 = scalar_lea.vmem %s1089_s8, 64  ;;  %p1144_p11 = scmp.ne.s32.totalorder %s1139_s27, 0 }
  0x40   : > { %p817_p6 = scmp.ne.s32.totalorder %s1089_s8, %s816_s20  ;;  %s888_s19 = smov [#allocation5]  }
  0x41   : > { %717 = vmatmul.mubr.msk.f32.vlgmr.msra.gmra.mrb[2].mxu1 %vm216_vm1, %v213_v7  ;;  %s820_s9 = sshll.u32 %s888_s19, 4  ;;  %s821_s9 = int_to_ptr.vmem [resolvable:$false] %s820_s9 }
  0x42   : > { %p818_p12 = pnand %p817_p6, %p1144_p11  ;;  %s822_s22 = scalar_lea.vmem %s821_s9, 128 }
  0x43   : > { %p823_p7 = scmp.lt.s32.totalorder %s1089_s8, %s821_s9  ;;  %p824_p10 = scmp.lt.s32.totalorder %s822_s22, %s816_s20 }
  0x44   : > { %p819_p13 = pneg %p818_p12 }
  0x45   : > { %p825_p2 = por %p824_p10, %p823_p7 }
  0x47   : > { %p826_p4 = pnand %p825_p2, %p819_p13 }
 0x110   : > { %v286_v13 = vpop.f32.mrb[0].mxu1 }
 0x111   : > { %v711_v15 = vpop.f32.mrb[1].mxu1  ;;  %v375_v16 = vrot.slane %v286_v13, %v374_v12  ;;  %v391_v21 = vrot.slane %v286_v13, %v390_v14  ;;  %v407_v31 = vrot.slane %v286_v13, %v406_v19  ;;  %v423_v44 = vrot.slane %v286_v13, %v422_v32 }
 0x113   : > { %v376_v26 = vmul.f32 %v375_v16, %v363_v17  ;;  %v384_v27 = vmul.f32 %v684_v18, %v375_v16  ;;  %v392_v33 = vmul.f32 %v391_v21, %v364_v24  ;;  %v400_v34 = vmul.f32 %v685_v25, %v391_v21 }
 0x114   : > { %v359_v20 = vpop.f32.mrb[2].mxu1  ;;  %v408_v45 = vmul.f32 %v407_v31, %v365_v37  ;;  %v416_v46 = vmul.f32 %v686_v38, %v407_v31  ;;  %v424_v56 = vmul.f32 %v423_v44, %v366_v49  ;;  %v432_v57 = vmul.f32 %v687_v50, %v423_v44 }
 0x115   : > { %v381_v22 = vrot.slane %v359_v20, %v374_v12  ;;  %v718_v23 = vpop.f32.mrb[3].mxu1  ;;  %v397_v30 = vrot.slane %v359_v20, %v390_v14  ;;  %v413_v39 = vrot.slane %v359_v20, %v406_v19  ;;  %v429_v51 = vrot.slane %v359_v20, %v422_v32 }
 0x117   : > { %v382_v28 = vmul.f32 %v684_v18, %v381_v22  ;;  %v386_v29 = vmul.f32 %v381_v22, %v363_v17  ;;  %v398_v41 = vmul.f32 %v685_v25, %v397_v30  ;;  %v402_v43 = vmul.f32 %v397_v30, %v364_v24 }
 0x118   : > { %v414_v53 = vmul.f32 %v686_v38, %v413_v39  ;;  %v418_v55 = vmul.f32 %v413_v39, %v365_v37  ;;  %v430_v61 = vmul.f32 %v687_v50, %v429_v51  ;;  %v434_v62 = vmul.f32 %v429_v51, %v366_v49 }
 0x119   : > { %v383_v35 = vsub.f32 %v376_v26, %v382_v28  ;;  %v387_v36 = vadd.f32 %v386_v29, %v384_v27 }
 0x11b   : > { %v393_v40 = vadd.f32 %v392_v33, %v383_v35  ;;  %v401_v42 = vadd.f32 %v400_v34, %v387_v36 }
 0x11d   : > { %v399_v47 = vsub.f32 %v393_v40, %v398_v41  ;;  %v403_v48 = vadd.f32 %v402_v43, %v401_v42 }
 0x11f   : > { %v409_v52 = vadd.f32 %v408_v45, %v399_v47  ;;  %v417_v54 = vadd.f32 %v416_v46, %v403_v48 }
 0x121   : > { %v415_v58 = vsub.f32 %v409_v52, %v414_v53  ;;  %v419_v59 = vadd.f32 %v418_v55, %v417_v54 }
 0x123   : > { %v425_v60 = vadd.f32 %v424_v56, %v415_v58  ;;  %v433_v63 = vadd.f32 %v432_v57, %v419_v59 }
 0x125   : > { %v431_v0 = vsub.f32 %v425_v60, %v430_v61  ;;  %v435_v2 = vadd.f32 %v434_v62, %v433_v63 }
 0x127   : > { %722 = vmatmul.mubr.msk.f32.vlgmr.msra.gmra.mrb[0].mxu0 %vm439_vm2, %v435_v2 }
 0x128   : > { %725 = vmatpush3.msra.mxu0 %v436_v3  ;;  %726 = vmatprep.mubr.msk.f32.mxu0 %vm886_vm0, %v887_v1 }
 0x12f   : > { %727 = vmatmul.mubr.msk.f32.vlgmr.msra.gmra.mrb[0].mxu0 %vm439_vm2, %v431_v0 }
 0x202   : > { %v582_v4 = vpop.f32.mrb[0].mxu0 }
 0x203   : > { %587 = vst.msk [vmem:[%s212_s11] sm:$0xf] %vm586_vm3, %v582_v4  ;;  %v728_v5 = vpop.f32.mrb[1].mxu0 }
 0x204   : > { %829 = shalt.err (!%p826_p4)
}
 0x205   : > { %s830_s7 = scalar_lea.hbm %s1087_s14, 64  ;;  %s834_s29 = scalar_lea.hbm %s1135_s4, 128 }
 0x206   : > { %p831_p5 = scmp.ne.s32.totalorder %s1087_s14, %s830_s7  ;;  %p835_p0 = scmp.lt.u32.totalorder %s1087_s14, %s1135_s4 }
 0x207   : > { %p836_p1 = scmp.lt.u32.totalorder %s834_s29, %s830_s7  ;;  %p838_p6 = scmp.lt.u32.totalorder %s830_s7, %s1087_s14 }
 0x208   : > { %p832_p8 = pnand %p831_p5, %p1144_p11 }
 0x209   : > { %p837_p3 = por %p836_p1, %p835_p0 }
 0x20a   : > { %p833_p9 = pneg %p832_p8 }
 0x20b   : > { %p839_p12 = por %p838_p6, %p837_p3 }
 0x20d   : > { %p840_p13 = pnand %p839_p12, %p833_p9 }
 0x20f   : > { %843 = shalt.err (!%p840_p13)
}
 0x210   : > { %739 = dma.vmem_to_hbm [thread:$0]  (%p1144_p11), %s1089_s8, 64, %s1087_s14, %s589_s26  }
 0x211 PF: > { %s614_s6 = sand.u32 1, %s870_s15   ;;  %p1145_p7 = scmp.ne.s32.totalorder %s1140_s28, 0 }
 0x212   : > { %p1146_p10 = scmp.ge.s32.totalorder %s882_s18, 2  ;;  %s615_s13 = scalar_lea.sflag [#allocation4], %s614_s6 }
 0x214   : > { %p746_p2 = pnand %p1146_p10, %p1145_p7 }
 0x216   : > { %865 = dma.done.wait (!%p746_p2), %s615_s13, 64  }
 0x217   : > { %867 = vsyncadd (!%p746_p2), %s615_s13, 4294967232  ;;  %p17_p4 = scmp.ge.s32.totalorder %s939_s21, 4   ;;  %s1147_s15 = smov %s874_s16 }
 0x218   : > { %s1148_s16 = smov %s878_s17  ;;  %s1149_s17 = smov %s951_s24 }
 0x219   : > { %s1150_s18 = smov %s939_s21  ;;  %19 = sbr.rel (!%p17_p4) target bundleno = 5 (0x5), region = 84 }
 0x220   :  { %620 = vsyncpa [#allocation3], 1 }
 0x221   :  { %622 = vsyncpa [#allocation3 + $0x1], 1 }
 0x222   :  { %623 = vsyncpa [#allocation4], 1 }
 0x223   :  { %625 = vsyncpa [#allocation4 + $0x1], 1 }

// kernel: spectral_conv1d_apply.1
= control target key start
LH: loop header
LB: loop body
LE: loop exit
PB: predicated region body
PF: predicated region fallthrough
CT: control target
= control target key end

     0   :  { %9 = vsyncpa [#allocation3], 0  ;;  %s1131_s0 = inlined_call_operand.hbm [shape: f32[2,4,16], index: 0, kind: input, shape index: {}]   ;;  %s1132_s1 = inlined_call_operand.vmem [shape: f32[2,16,8], index: 1, kind: input, shape index: {}]   ;;  %s1133_s2 = inlined_call_operand.vmem [shape: f32[2,4,4,8], index: 2, kind: input, shape index: {}]   ;;  %s1134_s3 = inlined_call_operand.vmem [shape: f32[2,8,16], index: 3, kind: input, shape index: {}]   ;;  %s1135_s4 = inlined_call_operand.hbm [shape: f32[2,4,16], index: 4, kind: output, shape index: {}]  }
   0x1   :  { %11 = vsyncpa [#allocation3 + $0x1], 0 }
   0x2   :  { %12 = vsyncpa [#allocation4], 0 }
   0x3   :  { %14 = vsyncpa [#allocation4 + $0x1], 0  ;;  %s914_s15 = smov 0   ;;  %s916_s16 = smov 0  }
   0x4   :  { %s918_s17 = smov 0   ;;  %s920_s18 = smov 0  }
   0x5 LB: > { %s935_s19 = sadd.s32 4294967295, %s882_s18   ;;  %s672_s20 = sadd.s32 4294967294, %s882_s18   ;;  %s882_s18 = sphi %s920_s18, %s1150_s18   ;;  %s878_s17 = sphi %s918_s17, %s1149_s17   ;;  %s874_s16 = sphi %s916_s16, %s1148_s16   ;;  %s870_s15 = sphi %s914_s15, %s1147_s15  }
   0x6   : > { %s939_s21 = sadd.s32 1, %s882_s18   ;;  %s27_s22 = sadd.s32 1, %s878_s17 }
   0x7   : > { %s24_s23 = ssub.s32 %s882_s18, %s939_s21  ;;  %p34_p0 = scmp.ne.s32.totalorder %s878_s17, %s874_s16 }
   0x8   : > { %p25_p1 = scmp.eq.s32.totalorder %s24_s23, 0  ;;  %p35_p2 = scmp.eq.s32.totalorder %s882_s18, 0 }
   0x9   : > { %p40_p3 = scmp.ne.s32.totalorder %s874_s16, %s870_s15  ;;  %p41_p4 = scmp.eq.s32.totalorder %s935_s19, 0 }
   0xa   : > { %s951_s24 = scalar_select %p25_p1, %s878_s17, %s27_s22  }
   0xb   : > { %p953_p5 = por %p35_p2, %p34_p0  ;;  %p957_p6 = por %p41_p4, %p40_p3 }
   0xc   : > { %p127_p7 = scmp.eq.s32.totalorder %s935_s19, 1  ;;  %p133_p8 = scmp.eq.s32.totalorder %s672_s20, 1 }
   0xd   : > { %p749_p10 = scmp.lt.s32.totalorder %s882_s18, 2  ;;  %s162_s29 = sand.u32 1, %s878_s17  }
   0xe   : > { %p964_p11 = por %p127_p7, %p34_p0  ;;  %p968_p12 = por %p133_p8, %p40_p3 }
   0xf   : > { %s676_s30 = sshll.u32 %s882_s18, 6  ;;  %s675_s5 = sshll.u32 %s162_s29, 2 }
  0x10   : > { %s1139_s27 = scalar_select %p964_p11, 1, 0 }
  0x11   : > { %s1140_s28 = scalar_select %p968_p12, 1, 0 }
  0x12   : > { %s977_s8 = scalar_lea.hbm %s1131_s0, %s676_s30  ;;  %s166_s9 = scalar_lea.vmem [#allocation2], %s675_s5 }
  0x13   : > { %s173_s10 = sshll.u32 %s166_s9, 4  ;;  %p981_p13 = pnand %p749_p10, %p953_p5  ;;  %s985_s10 = int_to_ptr.vmem [resolvable:$true] %s173_s10 }
  0x14   : > { %s163_s12 = scalar_lea.sflag [#allocation3], %s162_s29  ;;  %s786_s13 = scalar_lea.hbm %s977_s8, 64 }
  0x15   : > { %p787_p2 = scmp.ne.s32.totalorder %s977_s8, %s786_s13  ;;  %p788_p3 = pneg %p981_p13 }
  0x16   : > { %s791_s22 = scalar_lea.hbm %s1131_s0, 128  ;;  %p792_p5 = scmp.lt.u32.totalorder %s977_s8, %s1131_s0 }
  0x17   : > { %p789_p4 = pnand %p788_p3, %p787_p2  ;;  %p793_p8 = scmp.lt.u32.totalorder %s791_s22, %s786_s13 }
  0x18   : > { %p795_p9 = scmp.lt.u32.totalorder %s786_s13, %s977_s8 }
  0x19   : > { %p790_p7 = pneg %p789_p4  ;;  %p794_p10 = por %p793_p8, %p792_p5 }
  0x1b   : > { %p796_p0 = por %p795_p9, %p794_p10 }
  0x1d   : > { %p797_p1 = pnand %p796_p0, %p790_p7 }
  0x1f   : > { %800 = shalt.err (!%p797_p1)
}
  0x20   : > { %s801_s29 = scalar_lea.vmem %s985_s10, 64  ;;  %s884_s30 = smov [#allocation2]  }
  0x21   : > { %p802_p2 = scmp.ne.s32.totalorder %s985_s10, %s801_s29  ;;  %s806_s5 = sshll.u32 %s884_s30, 4  ;;  %s807_s5 = int_to_ptr.vmem [resolvable:$false] %s806_s5 }
  0x22   : > { %s808_s6 = scalar_lea.vmem %s807_s5, 128  ;;  %p809_p11 = scmp.lt.s32.totalorder %s985_s10, %s807_s5 }
  0x23   : > { %p804_p4 = pnand %p802_p2, %p788_p3  ;;  %p810_p5 = scmp.lt.s32.totalorder %s808_s6, %s801_s29 }
  0x25   : > { %p805_p12 = pneg %p804_p4  ;;  %p811_p8 = por %p810_p5, %p809_p11 }
  0x27   : > { %p812_p9 = pnand %p811_p8, %p805_p12 }
  0x29   : > { %815 = shalt.err (!%p812_p9)
}
  0x2a   : > { %744 = dma.hbm_to_vmem [thread:$0]  (!%p981_p13), %s977_s8, 64, %s985_s10, %s163_s12  }
  0x2b   : > { %p1142_p0 = scmp.lt.s32.totalorder %s882_s18, 3  ;;  %p1143_p1 = scmp.ge.s32.totalorder %s882_s18, 1 }
  0x2d   : > { %p179_p3 = pnand %p1143_p1, %p1142_p0 }
  0x2e   : > { %s1019_s7 = sand.u32 (!%p179_p3), 1, %s874_s16  }
  0x2f   : > { %182 = sbr.rel (%p179_p3) target bundleno = 529 (0x211), region = 36  ;;  %s678_s9 = sshll.u32 (!%p179_p3), %s1019_s7, 2 }
  0x30   : > { %s185_s13 = scalar_lea.sflag (!%p179_p3), [#allocation3], %s1019_s7  ;;  %s188_s11 = scalar_lea.vmem (!%p179_p3), [#allocation2], %s678_s9 }
  0x36   : > { %861 = dma.done.wait (%p957_p6), %s185_s13, 64  }
  0x37   : > { %863 = vsyncadd (%p957_p6), %s185_s13, 4294967232  ;;  %v885_v0 = vmov 0.0|0.0   ;;  %vm886_vm0 = vmmov 0   ;;  %v887_v1 = vmov 0.0   ;;  %v214_v2 = vld [vmem:[%s1132_s1] sm:$0xff]  ;;  %v215_v3 = vld [vmem:[%s1132_s1 + $0x8] sm:$0xff]  ;;  %v372_v10 = vlaneseq }
  0x38   : > { %729 = vmatprep.subr.bf16.mxu1 %v885_v0  ;;  %709 = vmatprep.mubr.msk.f32.mxu1 %vm886_vm0, %v887_v1  ;;  %v730_v4 = vpack.c.bf16 %v215_v3, %v214_v2  ;;  %v681_v5 = vld [vmem:[%s1132_s1 + $0x10] sm:$0xff]  ;;  %v682_v6 = vld [vmem:[%s1132_s1 + $0x18] sm:$0xff]  ;;  %v213_v7 = vld [vmem:[%s188_s11] sm:$0xf]  ;;  %vm216_vm1 = vcmask 130048   ;;  %vm439_vm2 = vcmask 64512  }
  0x39   : > { %719 = vmatprep.subr.mxu0 %v887_v1  ;;  %721 = vmatprep.mubr.msk.f32.mxu0 %vm886_vm0, %v887_v1  ;;  %v733_v8 = vpack.c.bf16 %v682_v6, %v681_v5  ;;  %v688_v9 = vld [vmem:[%s1134_s3 + $0x8] sm:$0xff]  ;;  %v373_v11 = vshrl.u32 %v372_v10, 7  ;;  %v363_v17 = vld [vmem:[%s1133_s2] sm:$0xf]  ;;  %v684_v18 = vld [vmem:[%s1133_s2 + $0x10] sm:$0xf] }
  0x3a   : > { %731 = vmatpush3.bf16.msra.mxu1 %v730_v4  ;;  %720 = vmatpush3.msra.mxu0 %v688_v9  ;;  %v364_v24 = vld [vmem:[%s1133_s2 + $0x4] sm:$0xf]  ;;  %v685_v25 = vld [vmem:[%s1133_s2 + $0x14] sm:$0xf]  ;;  %v365_v37 = vld [vmem:[%s1133_s2 + $0x8] sm:$0xf] }
  0x3b   : > { %732 = vmatprep.subr.bf16.mxu1 %v885_v0  ;;  %724 = vmatprep.subr.mxu0 %v887_v1  ;;  %v374_v12 = vsub.s32 0, %v373_v11  ;;  %v390_v14 = vsub.s32 1, %v373_v11  ;;  %v406_v19 = vsub.s32 2, %v373_v11  ;;  %v422_v32 = vsub.s32 3, %v373_v11  ;;  %v686_v38 = vld [vmem:[%s1133_s2 + $0x18] sm:$0xf] }
  0x3c   : > { %v366_v49 = vld [vmem:[%s1133_s2 + $0xc] sm:$0xf]  ;;  %v687_v50 = vld [vmem:[%s1133_s2 + $0x1c] sm:$0xf]  ;;  %v436_v3 = vld [vmem:[%s1134_s3] sm:$0xff]  ;;  %s692_s13 = sshll.u32 %s935_s19, 6 }
  0x3d   : > { %710 = vmatmul.mubr.msk.f32.vlgmr.msra.gmra.mrb[0].mxu1 %vm216_vm1, %v213_v7  ;;  %s212_s11 = scalar_lea.vmem [#allocation5], %s678_s9  ;;  %vm586_vm3 = vcmask 125952   ;;  %s1087_s14 = scalar_lea.hbm %s1135_s4, %s692_s13 }
  0x3e   : > { %734 = vmatpush3.bf16.msra.mxu1 %v733_v8  ;;  %716 = vmatprep.mubr.msk.f32.mxu1 %vm886_vm0, %v887_v1  ;;  %s602_s8 = sshll.u32 %s212_s11, 4  ;;  %s589_s26 = scalar_lea.sflag [#allocation4], %s1019_s7  ;;  %s1089_s8 = int_to_ptr.vmem [resolvable:$true] %s602_s8 }
  0x3f   : > { %s816_s20 = scalar_lea.vmem %s1089_s8, 64  ;;  %p1144_p11 = scmp.ne.s32.totalorder %s1139_s27, 0 }
  0x40   : > { %p817_p6 = scmp.ne.s32.totalorder %s1089_s8, %s816_s20  ;;  %s888_s19 = smov [#allocation5]  }
  0x41   : > { %717 = vmatmul.mubr.msk.f32.vlgmr.msra.gmra.mrb[2].mxu1 %vm216_vm1, %v213_v7  ;;  %s820_s9 = sshll.u32 %s888_s19, 4  ;;  %s821_s9 = int_to_ptr.vmem [resolvable:$false] %s820_s9 }
  0x42   : > { %p818_p12 = pnand %p817_p6, %p1144_p11  ;;  %s822_s22 = scalar_lea.vmem %s821_s9, 128 }
  0x43   : > { %p823_p7 = scmp.lt.s32.totalorder %s1089_s8, %s821_s9  ;;  %p824_p10 = scmp.lt.s32.totalorder %s822_s22, %s816_s20 }
  0x44   : > { %p819_p13 = pneg %p818_p12 }
  0x45   : > { %p825_p2 = por %p824_p10, %p823_p7 }
  0x47   : > { %p826_p4 = pnand %p825_p2, %p819_p13 }
 0x110   : > { %v286_v13 = vpop.f32.mrb[0].mxu1 }
 0x111   : > { %v711_v15 = vpop.f32.mrb[1].mxu1  ;;  %v375_v16 = vrot.slane %v286_v13, %v374_v12  ;;  %v391_v21 = vrot.slane %v286_v13, %v390_v14  ;;  %v407_v31 = vrot.slane %v286_v13, %v406_v19  ;;  %v423_v44 = vrot.slane %v286_v13, %v422_v32 }
 0x113   : > { %v376_v26 = vmul.f32 %v375_v16, %v363_v17  ;;  %v384_v27 = vmul.f32 %v684_v18, %v375_v16  ;;  %v392_v33 = vmul.f32 %v391_v21, %v364_v24  ;;  %v400_v34 = vmul.f32 %v685_v25, %v391_v21 }
 0x114   : > { %v359_v20 = vpop.f32.mrb[2].mxu1  ;;  %v408_v45 = vmul.f32 %v407_v31, %v365_v37  ;;  %v416_v46 = vmul.f32 %v686_v38, %v407_v31  ;;  %v424_v56 = vmul.f32 %v423_v44, %v366_v49  ;;  %v432_v57 = vmul.f32 %v687_v50, %v423_v44 }
 0x115   : > { %v381_v22 = vrot.slane %v359_v20, %v374_v12  ;;  %v718_v23 = vpop.f32.mrb[3].mxu1  ;;  %v397_v30 = vrot.slane %v359_v20, %v390_v14  ;;  %v413_v39 = vrot.slane %v359_v20, %v406_v19  ;;  %v429_v51 = vrot.slane %v359_v20, %v422_v32 }
 0x117   : > { %v382_v28 = vmul.f32 %v684_v18, %v381_v22  ;;  %v386_v29 = vmul.f32 %v381_v22, %v363_v17  ;;  %v398_v41 = vmul.f32 %v685_v25, %v397_v30  ;;  %v402_v43 = vmul.f32 %v397_v30, %v364_v24 }
 0x118   : > { %v414_v53 = vmul.f32 %v686_v38, %v413_v39  ;;  %v418_v55 = vmul.f32 %v413_v39, %v365_v37  ;;  %v430_v61 = vmul.f32 %v687_v50, %v429_v51  ;;  %v434_v62 = vmul.f32 %v429_v51, %v366_v49 }
 0x119   : > { %v383_v35 = vsub.f32 %v376_v26, %v382_v28  ;;  %v387_v36 = vadd.f32 %v386_v29, %v384_v27 }
 0x11b   : > { %v393_v40 = vadd.f32 %v392_v33, %v383_v35  ;;  %v401_v42 = vadd.f32 %v400_v34, %v387_v36 }
 0x11d   : > { %v399_v47 = vsub.f32 %v393_v40, %v398_v41  ;;  %v403_v48 = vadd.f32 %v402_v43, %v401_v42 }
 0x11f   : > { %v409_v52 = vadd.f32 %v408_v45, %v399_v47  ;;  %v417_v54 = vadd.f32 %v416_v46, %v403_v48 }
 0x121   : > { %v415_v58 = vsub.f32 %v409_v52, %v414_v53  ;;  %v419_v59 = vadd.f32 %v418_v55, %v417_v54 }
 0x123   : > { %v425_v60 = vadd.f32 %v424_v56, %v415_v58  ;;  %v433_v63 = vadd.f32 %v432_v57, %v419_v59 }
 0x125   : > { %v431_v0 = vsub.f32 %v425_v60, %v430_v61  ;;  %v435_v2 = vadd.f32 %v434_v62, %v433_v63 }
 0x127   : > { %722 = vmatmul.mubr.msk.f32.vlgmr.msra.gmra.mrb[0].mxu0 %vm439_vm2, %v435_v2 }
 0x128   : > { %725 = vmatpush3.msra.mxu0 %v436_v3  ;;  %726 = vmatprep.mubr.msk.f32.mxu0 %vm886_vm0, %v887_v1 }
 0x12f   : > { %727 = vmatmul.mubr.msk.f32.vlgmr.msra.gmra.mrb[0].mxu0 %vm439_vm2, %v431_v0 }
 0x202   : > { %v582_v4 = vpop.f32.mrb[0].mxu0 }
 0x203   : > { %587 = vst.msk [vmem:[%s212_s11] sm:$0xf] %vm586_vm3, %v582_v4  ;;  %v728_v5 = vpop.f32.mrb[1].mxu0 }
 0x204   : > { %829 = shalt.err (!%p826_p4)
}
 0x205   : > { %s830_s7 = scalar_lea.hbm %s1087_s14, 64  ;;  %s834_s29 = scalar_lea.hbm %s1135_s4, 128 }
 0x206   : > { %p831_p5 = scmp.ne.s32.totalorder %s1087_s14, %s830_s7  ;;  %p835_p0 = scmp.lt.u32.totalorder %s1087_s14, %s1135_s4 }
 0x207   : > { %p836_p1 = scmp.lt.u32.totalorder %s834_s29, %s830_s7  ;;  %p838_p6 = scmp.lt.u32.totalorder %s830_s7, %s1087_s14 }
 0x208   : > { %p832_p8 = pnand %p831_p5, %p1144_p11 }
 0x209   : > { %p837_p3 = por %p836_p1, %p835_p0 }
 0x20a   : > { %p833_p9 = pneg %p832_p8 }
 0x20b   : > { %p839_p12 = por %p838_p6, %p837_p3 }
 0x20d   : > { %p840_p13 = pnand %p839_p12, %p833_p9 }
 0x20f   : > { %843 = shalt.err (!%p840_p13)
}
 0x210   : > { %739 = dma.vmem_to_hbm [thread:$0]  (%p1144_p11), %s1089_s8, 64, %s1087_s14, %s589_s26  }
 0x211 PF: > { %s614_s6 = sand.u32 1, %s870_s15   ;;  %p1145_p7 = scmp.ne.s32.totalorder %s1140_s28, 0 }
 0x212   : > { %p1146_p10 = scmp.ge.s32.totalorder %s882_s18, 2  ;;  %s615_s13 = scalar_lea.sflag [#allocation4], %s614_s6 }
 0x214   : > { %p746_p2 = pnand %p1146_p10, %p1145_p7 }
 0x216   : > { %865 = dma.done.wait (!%p746_p2), %s615_s13, 64  }
 0x217   : > { %867 = vsyncadd (!%p746_p2), %s615_s13, 4294967232  ;;  %p17_p4 = scmp.ge.s32.totalorder %s939_s21, 4   ;;  %s1147_s15 = smov %s874_s16 }
 0x218   : > { %s1148_s16 = smov %s878_s17  ;;  %s1149_s17 = smov %s951_s24 }
 0x219   : > { %s1150_s18 = smov %s939_s21  ;;  %19 = sbr.rel (!%p17_p4) target bundleno = 5 (0x5), region = 84 }
 0x220   :  { %620 = vsyncpa [#allocation3], 1 }
 0x221   :  { %622 = vsyncpa [#allocation3 + $0x1], 1 }
 0x222   :  { %623 = vsyncpa [#allocation4], 1 }
 0x223   :  { %625 = vsyncpa [#allocation4 + $0x1], 1 }

</bundles_post_ra>
